<compile_context>
chip_gen: v7x
topology: tpu7x:2x2x1
jax: 0.10.0
libtpu: 0.0.40
codegen_flags: <defaults>
</compile_context>

<pallas_src>
import jax
import jax.numpy as jnp
from jax import lax
from jax.experimental import pallas as pl
from jax.experimental.pallas import tpu as pltpu

_LANES = 512   # preferred lane width (multiple of 128 -> lane-dense, unmasked vst)


def _srl(h, k):
    # Logical right shift on int32 (lowers to a signless shrui).
    return lax.shift_right_logical(h, jnp.int32(k))


def _fmix32(h):
    # murmur3 fmix32 finalizer: 2 int32 multiplies + 3 xor-shifts (VPU only).
    h = h ^ _srl(h, 16)
    h = h * jnp.int32(-2048144789)   # 0x85ebca6b
    h = h ^ _srl(h, 13)
    h = h * jnp.int32(-1028477387)   # 0xc2b2ae35
    h = h ^ _srl(h, 16)
    return h


def _bernoulli_act_kernel(seed_ref, x_ref, mask_ref, o_ref):
    tm, tn = x_ref.shape
    i = pl.program_id(0)

    # p = |tanh(x)| in f32 (tanh runs on the EUP slot); 24-bit keep threshold.
    p = jnp.abs(jnp.tanh(x_ref[...].astype(jnp.float32)))
    thresh = (p * 16777216.0).astype(jnp.int32)          # floor(p * 2^24)

    # Counter-based PRNG: one fmix32 round over the in-tile linear index mixed
    # with a per-tile seed.  tn is a power of two, so `* tn` lowers to a shift;
    # tile-local counters never overflow int32 regardless of tensor size.
    row = lax.broadcasted_iota(jnp.int32, (tm, tn), 0)
    col = lax.broadcasted_iota(jnp.int32, (tm, tn), 1)
    local = row * tn + col
    tile_seed = seed_ref[0] ^ (i * jnp.int32(-1640531527))   # golden-ratio mix
    u24 = _srl(_fmix32(local ^ tile_seed), 8)                # uniform in [0, 2^24)

    # bernoulli(p) fused with the mask: keep iff u24 < p*2^24; select directly
    # in the output dtype (no {0,1} temp, no f32 round-trip of the mask).
    o_ref[...] = jnp.where(u24 < thresh,
                           mask_ref[...].astype(o_ref.dtype),
                           jnp.zeros((), o_ref.dtype))


def _tile_rows_for_device():
    # Double-buffered footprint = 3 arrays x (tm * 512 * 4 B) x 2 buffers.
    #   v5e    : 16 MiB default scoped VMEM -> tm = 1024 (12 MiB)
    #   v6e/v7x: 32 MiB default scoped VMEM -> tm = 2048 (24 MiB)
    try:
        kind = jax.devices()[0].device_kind.lower()
    except Exception:
        return 1024
    return 1024 if "v5" in kind else 2048


def bernoulli_activation(x, mask, seed=0):
    """out = mask * bernoulli(|tanh(x)|); x and mask have identical shape."""
    orig_shape = x.shape
    out_dtype = jnp.result_type(x.dtype, mask.dtype)
    total = x.size

    # Pick a lane width that divides the element count so no padding / output
    # slice (two extra full-array HBM copies) is needed for typical shapes.
    tn = None
    for cand in (_LANES, 256, 128):
        if total % cand == 0:
            tn = cand
            break
    needs_pad = tn is None
    if needs_pad:
        tn = 128

    xf = jnp.ravel(x)
    mf = jnp.ravel(mask)
    if needs_pad:
        # Rare fallback: element count not a multiple of 128 -> minimal pad.
        pad = pl.cdiv(total, tn) * tn - total
        xf = jnp.pad(xf, (0, pad))          # tanh(0)=0 -> padded draws are 0
        mf = jnp.pad(mf, (0, pad))

    rows = xf.size // tn
    tile_rows = _tile_rows_for_device()
    tm = min(tile_rows, ((rows + 7) // 8) * 8)   # multiple of 8, capped
    grid = (pl.cdiv(rows, tm),)                  # partial last block: writes masked

    x2 = xf.reshape(rows, tn)
    m2 = mf.reshape(rows, tn)
    seed_arr = jnp.array([seed], dtype=jnp.int32)

    grid_spec = pltpu.PrefetchScalarGridSpec(
        num_scalar_prefetch=1,
        grid=grid,
        in_specs=[
            pl.BlockSpec((tm, tn), lambda i, seed: (i, 0)),
            pl.BlockSpec((tm, tn), lambda i, seed: (i, 0)),
        ],
        out_specs=pl.BlockSpec((tm, tn), lambda i, seed: (i, 0)),
    )

    out2 = pl.pallas_call(
        _bernoulli_act_kernel,
        out_shape=jax.ShapeDtypeStruct((rows, tn), out_dtype),
        grid_spec=grid_spec,
        compiler_params=pltpu.CompilerParams(
            # Independent tiles -> shard across both TensorCores on v7x.
            dimension_semantics=("parallel",),
        ),
    )(seed_arr, x2, m2)

    if needs_pad:
        return out2.reshape(-1)[:total].reshape(orig_shape)
    return out2.reshape(orig_shape)


if __name__ == "__main__":
    key = jax.random.PRNGKey(0)
    kx, km = jax.random.split(key)

    B, C, H, W = 2, 4, 16, 16
    x = jax.random.normal(kx, (B, C, H, W), dtype=jnp.float32)
    # Binary dropout/obfuscation-style mask.
    mask = (jax.random.uniform(km, (B, C, H, W)) > 0.5).astype(jnp.float32)

    out = jax.block_until_ready(bernoulli_activation(x, mask, seed=1234))

    # Sanity checks: correct shape/dtype, values in {0,1}*mask, masked -> 0.
    assert out.shape == (B, C, H, W)
    assert out.dtype == x.dtype
    assert bool(jnp.all((out == 0.0) | (out == 1.0)))
    assert bool(jnp.all(jnp.where(mask == 0.0, out == 0.0, True)))

    print("KERNEL_OK")
</pallas_src>

<mosaic_0001>
module attributes {stable_mosaic.version = 11 : i64} {
  func.func @_bernoulli_act_kernel(%arg0: i32, %arg1: memref<1xi32, #tpu.memory_space<smem>>, %arg2: memref<8x512xf32, #tpu.memory_space<vmem>>, %arg3: memref<8x512xf32, #tpu.memory_space<vmem>>, %arg4: memref<8x512xf32, #tpu.memory_space<vmem>>) attributes {dimension_semantics = [#tpu.dimension_semantics<parallel>], iteration_bounds = array<i64: 1>, scalar_prefetch = 1 : i64, scratch_operands = 0 : i64, tpu.core_type = #tpu.core_type<tc>, window_params = [{transform_indices = @transform_0, window_bounds = array<i64: 8, 512>}, {transform_indices = @transform_1, window_bounds = array<i64: 8, 512>}, {transform_indices = @transform_2, window_bounds = array<i64: 8, 512>}]} {
    %c0 = arith.constant 0 : index
    %c0_0 = arith.constant 0 : index
    %0 = vector.load %arg2[%c0, %c0_0] : memref<8x512xf32, #tpu.memory_space<vmem>>, vector<8x512xf32>
    %1 = math.tanh %0 : vector<8x512xf32>
    %2 = math.absf %1 : vector<8x512xf32>
    %cst = arith.constant 0x4B800000 : f32
    %3 = vector.broadcast %cst : f32 to vector<8x512xf32>
    %4 = arith.mulf %2, %3 : vector<8x512xf32>
    %5 = arith.fptosi %4 : vector<8x512xf32> to vector<8x512xi32>
    %6 = tpu.iota {dimensions = array<i32: 0>} : vector<8x512xi32>
    %7 = tpu.iota {dimensions = array<i32: 1>} : vector<8x512xi32>
    %c512_i32 = arith.constant 512 : i32
    %8 = vector.broadcast %c512_i32 : i32 to vector<8x512xi32>
    %9 = arith.muli %6, %8 : vector<8x512xi32>
    %10 = arith.addi %9, %7 : vector<8x512xi32>
    %c0_1 = arith.constant 0 : index
    %11 = memref.load %arg1[%c0_1] : memref<1xi32, #tpu.memory_space<smem>>
    %c-1640531527_i32 = arith.constant -1640531527 : i32
    %12 = arith.muli %arg0, %c-1640531527_i32 : i32
    %13 = arith.xori %11, %12 : i32
    %14 = vector.broadcast %13 : i32 to vector<8x512xi32>
    %15 = arith.xori %10, %14 : vector<8x512xi32>
    %c16_i32 = arith.constant 16 : i32
    %16 = vector.broadcast %c16_i32 : i32 to vector<8x512xi32>
    %17 = arith.shrui %15, %16 : vector<8x512xi32>
    %18 = arith.xori %15, %17 : vector<8x512xi32>
    %c-2048144789_i32 = arith.constant -2048144789 : i32
    %19 = vector.broadcast %c-2048144789_i32 : i32 to vector<8x512xi32>
    %20 = arith.muli %18, %19 : vector<8x512xi32>
    %c13_i32 = arith.constant 13 : i32
    %21 = vector.broadcast %c13_i32 : i32 to vector<8x512xi32>
    %22 = arith.shrui %20, %21 : vector<8x512xi32>
    %23 = arith.xori %20, %22 : vector<8x512xi32>
    %c-1028477387_i32 = arith.constant -1028477387 : i32
    %24 = vector.broadcast %c-1028477387_i32 : i32 to vector<8x512xi32>
    %25 = arith.muli %23, %24 : vector<8x512xi32>
    %c16_i32_2 = arith.constant 16 : i32
    %26 = vector.broadcast %c16_i32_2 : i32 to vector<8x512xi32>
    %27 = arith.shrui %25, %26 : vector<8x512xi32>
    %28 = arith.xori %25, %27 : vector<8x512xi32>
    %c8_i32 = arith.constant 8 : i32
    %29 = vector.broadcast %c8_i32 : i32 to vector<8x512xi32>
    %30 = arith.shrui %28, %29 : vector<8x512xi32>
    %31 = arith.cmpi slt, %30, %5 : vector<8x512xi32>
    %c0_3 = arith.constant 0 : index
    %c0_4 = arith.constant 0 : index
    %32 = vector.load %arg3[%c0_3, %c0_4] : memref<8x512xf32, #tpu.memory_space<vmem>>, vector<8x512xf32>
    %cst_5 = arith.constant 0.000000e+00 : f32
    %33 = vector.broadcast %cst_5 : f32 to vector<8x512xf32>
    %34 = arith.select %31, %32, %33 : vector<8x512xi1>, vector<8x512xf32>
    %c0_6 = arith.constant 0 : index
    %c0_7 = arith.constant 0 : index
    %35 = vector.load %arg4[%c0_6, %c0_7] : memref<8x512xf32, #tpu.memory_space<vmem>>, vector<8x512xf32>
    tpu.vector_store %arg4[%c0_6, %c0_7], %34 {strides = array<i32>} : memref<8x512xf32, #tpu.memory_space<vmem>>, vector<8x512xf32>,
    return
  }
  func.func @transform_0(%arg0: i32, %arg1: memref<1xi32, #tpu.memory_space<smem>>) -> (i32, i32) {
    %c0_i32 = arith.constant 0 : i32
    %c0_i32_0 = arith.constant 0 : i32
    return %arg0, %c0_i32 : i32, i32
  }
  func.func @transform_1(%arg0: i32, %arg1: memref<1xi32, #tpu.memory_space<smem>>) -> (i32, i32) {
    %c0_i32 = arith.constant 0 : i32
    %c0_i32_0 = arith.constant 0 : i32
    return %arg0, %c0_i32 : i32, i32
  }
  func.func @transform_2(%arg0: i32, %arg1: memref<1xi32, #tpu.memory_space<smem>>) -> (i32, i32) {
    %c0_i32 = arith.constant 0 : i32
    %c0_i32_0 = arith.constant 0 : i32
    return %arg0, %c0_i32 : i32, i32
  }
}

</mosaic_0001>

<bundles_post_ra>
// kernel: tpu_custom_call.1
= control target key start
LH: loop header
LB: loop body
LE: loop exit
PB: predicated region body
PF: predicated region fallthrough
CT: control target
= control target key end

     0   :  { %9 = vsyncpa [#allocation5], 0  ;;  %s352_s0 = inlined_call_operand.<no memory space> [shape: s32[1], index: 0, kind: input, shape index: {}]   ;;  %s353_s1 = inlined_call_operand.hbm [shape: f32[4,512], index: 1, kind: input, shape index: {}]   ;;  %s354_s2 = inlined_call_operand.hbm [shape: f32[4,512], index: 2, kind: input, shape index: {}]   ;;  %s355_s3 = inlined_call_operand.hbm [shape: f32[4,512], index: 3, kind: output, shape index: {}]  }
   0x1   :  { %10 = vsyncpa [#allocation8], 0 }
   0x2   :  { %11 = vsyncpa [#allocation6], 0 }
   0x3   :  { %16 = vsyncadd [#allocation5], 256  ;;  %s279_s12 = smov [#allocation4]   ;;  %s207_s16 = scalar_lea.hbm %s353_s1, 256 }
   0x4   :  { %s17_s13 = sshll.u32 %s279_s12, 4  ;;  %p208_p0 = scmp.ne.s32.totalorder %s353_s1, %s207_s16  ;;  %s18_s13 = int_to_ptr.vmem [resolvable:$true] %s17_s13 }
   0x5   :  { %p211_p1 = scmp.lt.u32.totalorder %s207_s16, %s353_s1 }
   0x7   :  { %p213_p2 = pnand %p211_p1, %p208_p0 }
   0x9   :  { %216 = shalt.err (!%p213_p2)
}
   0xa   :  { %s217_s21 = scalar_lea.vmem %s18_s13, 256  ;;  %s221_s22 = scalar_lea.vmem %s18_s13, 512 }
   0xb   :  { %p218_p3 = scmp.ne.s32.totalorder %s18_s13, %s217_s21  ;;  %p222_p4 = scmp.lt.s32.totalorder %s18_s13, %s18_s13 }
   0xc   :  { %p223_p5 = scmp.lt.s32.totalorder %s221_s22, %s217_s21 }
   0xe   :  { %p224_p6 = por %p223_p5, %p222_p4 }
  0x10   :  { %p225_p7 = pnand %p224_p6, %p218_p3 }
  0x12   :  { %228 = shalt.err (!%p225_p7)
}
  0x13   :  { %s280_s23 = smov 256   ;;  %s281_s24 = smov 16  }
  0x14   :  { %23 = dma.hbm_to_vmem [thread:$0]  %s353_s1, 256, %s18_s13, [#allocation5], %s280_s23, %s280_s23, %s281_s24  }
  0x15   :  { %28 = vsyncadd [#allocation8], 256  ;;  %s282_s27 = smov [#allocation7]   ;;  %s229_s4 = scalar_lea.hbm %s354_s2, 256 }
  0x16   :  { %s29_s28 = sshll.u32 %s282_s27, 4  ;;  %p230_p8 = scmp.ne.s32.totalorder %s354_s2, %s229_s4  ;;  %s30_s28 = int_to_ptr.vmem [resolvable:$true] %s29_s28 }
  0x17   :  { %p233_p9 = scmp.lt.u32.totalorder %s229_s4, %s354_s2 }
  0x19   :  { %p235_p10 = pnand %p233_p9, %p230_p8 }
  0x1b   :  { %238 = shalt.err (!%p235_p10)
}
  0x1c   :  { %s239_s9 = scalar_lea.vmem %s30_s28, 256  ;;  %s243_s1 = scalar_lea.vmem %s30_s28, 512 }
  0x1d   :  { %p240_p11 = scmp.ne.s32.totalorder %s30_s28, %s239_s9  ;;  %p244_p12 = scmp.lt.s32.totalorder %s30_s28, %s30_s28 }
  0x1e   :  { %p245_p13 = scmp.lt.s32.totalorder %s243_s1, %s239_s9 }
  0x20   :  { %p246_p0 = por %p245_p13, %p244_p12 }
  0x22   :  { %p247_p1 = pnand %p246_p0, %p240_p11 }
  0x24   :  { %250 = shalt.err (!%p247_p1)
}
  0x25   :  { %35 = dma.hbm_to_vmem [thread:$0]  %s354_s2, 256, %s30_s28, [#allocation8], %s280_s23, %s280_s23, %s281_s24  }
  0x26   :  { %273 = dma.done.wait [#allocation5], 512  }
  0x27   :  { %274 = vsyncadd [#allocation5], 4294966784 }
  0x28   :  { %275 = dma.done.wait [#allocation8], 512  }
  0x29   :  { %276 = vsyncadd [#allocation8], 4294966784  ;;  %v62_v0 = vlaneseq  ;;  %v77_v7 = vstv %s352_s0  ;;  %v42_v12 = vld [vmem:[#allocation4] sm:$0xff]  ;;  %v44_v13 = vld [vmem:[#allocation4 + $0x10] sm:$0xff] }
  0x2a   :  { %199 = vtanh.f32 %v42_v12  ;;  %v43_v17 = vld [vmem:[#allocation4 + $0x8] sm:$0xff]  ;;  %v45_v18 = vld [vmem:[#allocation4 + $0x18] sm:$0xff] }
  0x2b   :  { %v63_v1 = vshrl.u32 %v62_v0, 7  ;;  %v65_v2 = vand.u32 127, %v62_v0  ;;  %201 = vtanh.f32 %v44_v13 }
  0x2c   :  { %203 = vtanh.f32 %v43_v17  ;;  %v198_v17 = vld [vmem:[#allocation7 + $0xc] ss:$16 sps:$4 sm:$0xff]  }
  0x2d   :  { %v66_v3 = vadd.s32 128, %v65_v2  ;;  %v69_v4 = vmul.u32 512, %v63_v1  ;;  %v67_v5 = vadd.s32 256, %v65_v2  ;;  %v68_v6 = vadd.s32 384, %v65_v2 }
  0x2e   :  { %205 = vtanh.f32 %v45_v18 }
  0x2f   :  { %v70_v8 = vadd.s32 %v69_v4, %v65_v2  ;;  %v71_v9 = vadd.s32 %v69_v4, %v66_v3  ;;  %v72_v10 = vadd.s32 %v69_v4, %v67_v5  ;;  %v73_v11 = vadd.s32 %v69_v4, %v68_v6 }
  0x31   :  { %v78_v14 = vxor.u32 %v77_v7, %v70_v8  ;;  %v79_v15 = vxor.u32 %v77_v7, %v71_v9  ;;  %v80_v16 = vxor.u32 %v77_v7, %v72_v10  ;;  %v81_v19 = vxor.u32 %v77_v7, %v73_v11  ;;  %v193_v7 = vld [vmem:[#allocation7] ss:$16 sps:$4 sm:$0xff]   ;;  %v195_v8 = vld [vmem:[#allocation7 + $0x4] ss:$16 sps:$4 sm:$0xff]  }
  0x33   :  { %v82_v20 = vshrl.u32 %v78_v14, 16  ;;  %v83_v21 = vshrl.u32 %v79_v15, 16  ;;  %v84_v22 = vshrl.u32 %v80_v16, 16  ;;  %v85_v23 = vshrl.u32 %v81_v19, 16 }
  0x34   :  { %v200_v36 = vpop.eup %199 }
  0x35   :  { %v86_v24 = vxor.u32 %v82_v20, %v78_v14  ;;  %v87_v25 = vxor.u32 %v83_v21, %v79_v15  ;;  %v88_v26 = vxor.u32 %v84_v22, %v80_v16  ;;  %v89_v27 = vxor.u32 %v85_v23, %v81_v19  ;;  %v202_v39 = vpop.eup %201  ;;  %v196_v16 = vld [vmem:[#allocation7 + $0x8] ss:$16 sps:$4 sm:$0xff]  }
  0x36   :  { %v50_v40 = vand.u32 2147483647, %v200_v36  ;;  %v204_v43 = vpop.eup %203  ;;  %v52_v44 = vand.u32 2147483647, %v202_v39 }
  0x37   :  { %v90_v28 = vmul.u32 2246822507, %v86_v24  ;;  %v91_v29 = vmul.u32 2246822507, %v87_v25  ;;  %v51_v49 = vand.u32 2147483647, %v204_v43 }
  0x38   :  { %v92_v30 = vmul.u32 2246822507, %v88_v26  ;;  %v93_v31 = vmul.u32 2246822507, %v89_v27  ;;  %v206_v47 = vpop.eup %205  ;;  %v54_v48 = vmul.f32 16777216.0, %v50_v40  ;;  %v56_v51 = vmul.f32 16777216.0, %v52_v44 }
  0x39   :  { %v94_v32 = vshrl.u32 %v90_v28, 13  ;;  %v95_v33 = vshrl.u32 %v91_v29, 13  ;;  %v53_v54 = vand.u32 2147483647, %v206_v47  ;;  %v55_v56 = vmul.f32 16777216.0, %v51_v49 }
  0x3a   :  { %v96_v34 = vshrl.u32 %v92_v30, 13  ;;  %v97_v35 = vshrl.u32 %v93_v31, 13  ;;  %v180_v55 = vtrunc.f32 %v54_v48  ;;  %v184_v59 = vtrunc.f32 %v56_v51 }
  0x3b   :  { %v98_v37 = vxor.u32 %v94_v32, %v90_v28  ;;  %v99_v38 = vxor.u32 %v95_v33, %v91_v29  ;;  %v57_v62 = vmul.f32 16777216.0, %v53_v54  ;;  %v182_v0 = vtrunc.f32 %v55_v56 }
  0x3c   :  { %v100_v41 = vxor.u32 %v96_v34, %v92_v30  ;;  %v101_v42 = vxor.u32 %v97_v35, %v93_v31  ;;  %v181_v63 = vcvt.f32.s32 %v180_v55  ;;  %v185_v3 = vcvt.f32.s32 %v184_v59 }
  0x3d   :  { %v102_v45 = vmul.u32 3266489909, %v98_v37  ;;  %v103_v46 = vmul.u32 3266489909, %v99_v38  ;;  %v186_v6 = vtrunc.f32 %v57_v62  ;;  %v183_v9 = vcvt.f32.s32 %v182_v0 }
  0x3e   :  { %v104_v50 = vmul.u32 3266489909, %v100_v41  ;;  %v105_v57 = vmul.u32 3266489909, %v101_v42  ;;  %v118_v11 = vcombine.low %v181_v63, %v185_v3  ;;  %v119_v12 = vcombine.high %v181_v63, %v185_v3 }
  0x3f   :  { %v106_v52 = vshrl.u32 %v102_v45, 16  ;;  %v107_v53 = vshrl.u32 %v103_v46, 16  ;;  %v187_v13 = vcvt.f32.s32 %v186_v6 }
  0x40   :  { %v108_v58 = vshrl.u32 %v104_v50, 16  ;;  %v109_v1 = vshrl.u32 %v105_v57, 16 }
  0x41   :  { %v110_v60 = vxor.u32 %v106_v52, %v102_v45  ;;  %v111_v61 = vxor.u32 %v107_v53, %v103_v46  ;;  %v120_v18 = vcombine.low %v183_v9, %v187_v13  ;;  %v121_v19 = vcombine.high %v183_v9, %v187_v13 }
  0x42   :  { %v112_v2 = vxor.u32 %v108_v58, %v104_v50  ;;  %v113_v10 = vxor.u32 %v109_v1, %v105_v57 }
  0x43   :  { %v114_v4 = vshrl.u32 %v110_v60, 8  ;;  %v115_v5 = vshrl.u32 %v111_v61, 8 }
  0x44   :  { %v116_v14 = vshrl.u32 %v112_v2, 8  ;;  %v117_v15 = vshrl.u32 %v113_v10, 8 }
  0x45   :  { %vm122_vm0 = vcmp.lt.s32.totalorder %v114_v4, %v118_v11  ;;  %vm123_vm1 = vcmp.lt.s32.totalorder %v115_v5, %v119_v12 }
  0x46   :  { %v142_v20 = vsel %vm122_vm0, %v193_v7, 0.0  ;;  %v143_v21 = vsel %vm123_vm1, %v195_v8, 0.0  ;;  %vm124_vm2 = vcmp.lt.s32.totalorder %v116_v14, %v120_v18  ;;  %vm125_vm3 = vcmp.lt.s32.totalorder %v117_v15, %v121_v19 }
  0x47   :  { %v150_v22 = vcombine.low %v142_v20, %v143_v21  ;;  %v151_v23 = vcombine.high %v142_v20, %v143_v21  ;;  %v144_v24 = vsel %vm124_vm2, %v196_v16, 0.0  ;;  %v145_v25 = vsel %vm125_vm3, %v198_v17, 0.0 }
  0x48   :  { %v152_v26 = vcombine.low %v144_v24, %v145_v25  ;;  %v153_v27 = vcombine.high %v144_v24, %v145_v25 }
  0x49   :  { %158 = vst [vmem:[#allocation9] sm:$0xff] %v150_v22  ;;  %160 = vst [vmem:[#allocation9 + $0x10] sm:$0xff] %v151_v23 }
  0x4a   :  { %159 = vst [vmem:[#allocation9 + $0x8] sm:$0xff] %v152_v26  ;;  %161 = vst [vmem:[#allocation9 + $0x18] sm:$0xff] %v153_v27 }
  0x4b   :  { %166 = vsyncadd [#allocation6], 256  ;;  %s283_s0 = smov [#allocation9]  }
  0x4c   :  { %s167_s2 = sshll.u32 %s283_s0, 4  ;;  %s168_s2 = int_to_ptr.vmem [resolvable:$true] %s167_s2 }
  0x4d   :  { %s251_s14 = scalar_lea.vmem %s168_s2, 256  ;;  %s255_s15 = scalar_lea.vmem %s168_s2, 512 }
  0x4e   :  { %p252_p2 = scmp.ne.s32.totalorder %s168_s2, %s251_s14  ;;  %p256_p3 = scmp.lt.s32.totalorder %s168_s2, %s168_s2 }
  0x4f   :  { %p257_p4 = scmp.lt.s32.totalorder %s255_s15, %s251_s14 }
  0x51   :  { %p258_p5 = por %p257_p4, %p256_p3 }
  0x53   :  { %p259_p6 = pnand %p258_p5, %p252_p2 }
  0x55   :  { %262 = shalt.err (!%p259_p6)
}
  0x56   :  { %s263_s18 = scalar_lea.hbm %s355_s3, 256 }
  0x57   :  { %p264_p7 = scmp.ne.s32.totalorder %s355_s3, %s263_s18  ;;  %p267_p8 = scmp.lt.u32.totalorder %s263_s18, %s355_s3 }
  0x59   :  { %p269_p9 = pnand %p267_p8, %p264_p7 }
  0x5b   :  { %272 = shalt.err (!%p269_p9)
}
  0x5c   :  { %173 = dma.vmem_to_hbm [thread:$0]  %s168_s2, 256, %s355_s3, [#allocation6], %s280_s23, %s280_s23, %s281_s24  }
  0x5d   :  { %277 = dma.done.wait [#allocation6], 512  }
  0x5e   :  { %278 = vsyncadd [#allocation6], 4294966784 }
  0x5f   :  { %177 = vsyncpa [#allocation5], 1 }
  0x60   :  { %178 = vsyncpa [#allocation8], 1 }
  0x61   :  { %179 = vsyncpa [#allocation6], 1 }

</bundles_post_ra>
